<compile_context>
chip_gen: v5e
topology: v5e:2x2
jax: 0.10.0
libtpu: 0.0.40
codegen_flags: <defaults>
</compile_context>

<pallas_src>
import numpy as np
import jax
import jax.numpy as jnp
from jax.experimental import pallas as pl
from jax.experimental.pallas import tpu as pltpu

# Small synthetic-BERT configuration (scaled down from n_input=768, n_output=300).
VOCAB = 64     # vocabulary size
L     = 8      # sequence length
H     = 32     # hidden size ("n_input" of the Linear head)
NHEAD = 2      # attention heads
DHEAD = H // NHEAD
FFN   = 64     # feed-forward inner size
NOUT  = 16     # "n_output" of the Linear head
B     = 2      # batch
BL    = B * L  # total rows processed by the kernel

WPAD  = 128    # lane-dense packed-slab width (multiple of 128)
NEG   = -1e9   # additive mask value

# Row offsets of each weight matrix inside the packed weight slab (wslab).
R_QKV, R_WO, R_W1, R_W2, R_WL = 0, H, 2 * H, 3 * H, 3 * H + FFN
W_ROWS = 4 * H + FFN                               # 192 rows x 128 lanes = 96 KiB

# Row index of each bias / LayerNorm vector inside the packed bias slab (bslab).
(BR_QKV, BR_O, BR_LN1G, BR_LN1B, BR_1, BR_2, BR_LN2G, BR_LN2B, BR_LIN) = range(9)
B_ROWS = 16

# Compile-time block-diagonal additive mask: rows may only attend to keys of
# the same sequence (numpy constant, added to the key-padding mask in the
# wrapper -> one tiny fused XLA op, passed to the kernel as a (BL, BL) input).
_BLOCK_MASK = np.where(
    (np.arange(BL)[:, None] // L) == (np.arange(BL)[None, :] // L),
    np.float32(0.0), np.float32(NEG)).astype(np.float32)


def _layernorm(x, g, b, eps=1e-12):
    mu = jnp.mean(x, axis=-1, keepdims=True)
    var = jnp.mean((x - mu) ** 2, axis=-1, keepdims=True)
    return (x - mu) * jax.lax.rsqrt(var + eps) * g + b


def _erf(x):
    # Abramowitz & Stegun 7.1.26 (|err| < 1.5e-7): exact-GELU parity with the
    # PyTorch/HF reference using only exp/mul/add/select (safe TPU lowering).
    p = 0.3275911
    a1, a2, a3, a4, a5 = (0.254829592, -0.284496736, 1.421413741,
                          -1.453152027, 1.061405429)
    sgn = jnp.where(x >= 0.0, 1.0, -1.0)
    ax = jnp.abs(x)
    t = 1.0 / (1.0 + p * ax)
    poly = ((((a5 * t + a4) * t + a3) * t + a2) * t + a1) * t
    return sgn * (1.0 - poly * jnp.exp(-ax * ax))


def _gelu_exact(x):
    return 0.5 * x * (1.0 + _erf(x * 0.7071067811865476))


def text_encoder_kernel(ids_ref, mask_ref, emb_ref, w_ref, b_ref, out_ref):
    """Single invocation: embedding + 1-layer BERT encoder + Linear head."""
    # ---- embedding gather fused in-kernel as a one-hot matmul (1 MXU push) ----
    ids = ids_ref[...]                                            # (BL, 1) int32
    lanes = jax.lax.broadcasted_iota(jnp.int32, (BL, VOCAB), 1)
    onehot = jnp.where(lanes == ids, 1.0, 0.0)                    # (BL, VOCAB) f32
    x = jnp.dot(onehot, emb_ref[...],
                preferred_element_type=jnp.float32)               # (BL, H)

    # ---- additive attention mask (padding keys + block-diagonal), hoisted ----
    mask = mask_ref[...]                                          # (BL, BL)

    # ---- fused Q/K/V projection: ONE matmul + ONE bias add ----
    wqkv = w_ref[R_QKV:R_QKV + H, 0:3 * H]                        # (H, 3H)
    bqkv = b_ref[BR_QKV:BR_QKV + 1, 0:3 * H]
    qkv = jnp.dot(x, wqkv, preferred_element_type=jnp.float32) + bqkv   # (BL, 3H)

    # ---- per-head attention over ALL rows at once; accumulate into W_O ----
    scale = 1.0 / (float(DHEAD) ** 0.5)
    attn = jnp.zeros((BL, H), jnp.float32)
    for h in range(NHEAD):                                        # NHEAD=2, static
        c = h * DHEAD
        qh = qkv[:, c:c + DHEAD]                                  # (BL, DHEAD)
        kh = qkv[:, H + c:H + c + DHEAD]
        vh = qkv[:, 2 * H + c:2 * H + c + DHEAD]
        # q @ k^T without an explicit transpose: contract last dims.
        s = jax.lax.dot_general(
            qh, kh, (((1,), (1,)), ((), ())),
            preferred_element_type=jnp.float32) * scale + mask    # (BL, BL)
        s = s - jnp.max(s, axis=-1, keepdims=True)
        p = jnp.exp(s)
        # EUP reciprocal (approx); swap for exact division if bit-parity needed.
        p = p * pl.reciprocal(jnp.sum(p, axis=-1, keepdims=True), approx=True)
        ctx = jnp.dot(p, vh, preferred_element_type=jnp.float32)  # (BL, DHEAD)
        wo_h = w_ref[R_WO + c:R_WO + c + DHEAD, 0:H]              # sublane slice
        attn = attn + jnp.dot(ctx, wo_h, preferred_element_type=jnp.float32)
    attn = attn + b_ref[BR_O:BR_O + 1, 0:H]

    # ---- residual + LayerNorm 1 ----
    h1 = _layernorm(x + attn,
                    b_ref[BR_LN1G:BR_LN1G + 1, 0:H],
                    b_ref[BR_LN1B:BR_LN1B + 1, 0:H])

    # ---- feed-forward (exact erf GELU, matching HF BERT) ----
    ff = jnp.dot(h1, w_ref[R_W1:R_W1 + H, 0:FFN],
                 preferred_element_type=jnp.float32) + b_ref[BR_1:BR_1 + 1, 0:FFN]
    ff = _gelu_exact(ff)
    ff = jnp.dot(ff, w_ref[R_W2:R_W2 + FFN, 0:H],
                 preferred_element_type=jnp.float32) + b_ref[BR_2:BR_2 + 1, 0:H]
    h2 = _layernorm(h1 + ff,
                    b_ref[BR_LN2G:BR_LN2G + 1, 0:H],
                    b_ref[BR_LN2B:BR_LN2B + 1, 0:H])

    # ---- Linear head over ALL rows against a 128-lane padded W:
    #      one MXU push, one lane-dense (BL, 128) store. CLS rows picked outside.
    out_ref[...] = (jnp.dot(h2, w_ref[R_WL:R_WL + H, :],
                            preferred_element_type=jnp.float32)
                    + b_ref[BR_LIN:BR_LIN + 1, :])                # (BL, 128)


def init_params(key):
    ks = jax.random.split(key, 10)
    n = lambda k, shp, s: jax.random.normal(k, shp, jnp.float32) * s
    return {
        "embedding": n(ks[0], (VOCAB, H), 0.02),
        "wq": n(ks[1], (H, H), 0.05), "bq": jnp.zeros((1, H), jnp.float32),
        "wk": n(ks[2], (H, H), 0.05), "bk": jnp.zeros((1, H), jnp.float32),
        "wv": n(ks[3], (H, H), 0.05), "bv": jnp.zeros((1, H), jnp.float32),
        "wo": n(ks[4], (H, H), 0.05), "bo": jnp.zeros((1, H), jnp.float32),
        "ln1g": jnp.ones((1, H), jnp.float32), "ln1b": jnp.zeros((1, H), jnp.float32),
        "w1": n(ks[5], (H, FFN), 0.05), "b1": jnp.zeros((1, FFN), jnp.float32),
        "w2": n(ks[6], (FFN, H), 0.05), "b2": jnp.zeros((1, H), jnp.float32),
        "ln2g": jnp.ones((1, H), jnp.float32), "ln2b": jnp.zeros((1, H), jnp.float32),
        # nn.Linear(n_input, n_output): torch weight is (NOUT, H); stored here
        # pre-transposed as (H, NOUT) so the kernel does rows @ W.
        "wlin": n(ks[7], (H, NOUT), 0.05), "blin": n(ks[8], (1, NOUT), 0.05),
    }


def pack_params(p):
    """Pack weights/biases into two lane-dense slabs (fused-QKV layout)."""
    def padw(a):
        return jnp.pad(a, ((0, 0), (0, WPAD - a.shape[1])))

    wqkv = jnp.concatenate([p["wq"], p["wk"], p["wv"]], axis=1)       # (H, 3H)
    wslab = jnp.concatenate(
        [padw(wqkv), padw(p["wo"]), padw(p["w1"]), padw(p["w2"]), padw(p["wlin"])],
        axis=0)
    assert wslab.shape == (W_ROWS, WPAD)

    bqkv = jnp.concatenate([p["bq"], p["bk"], p["bv"]], axis=1)       # (1, 3H)
    brows = [bqkv, p["bo"], p["ln1g"], p["ln1b"], p["b1"],
             p["b2"], p["ln2g"], p["ln2b"], p["blin"]]
    bslab = jnp.concatenate([padw(r) for r in brows], axis=0)
    bslab = jnp.pad(bslab, ((0, B_ROWS - bslab.shape[0]), (0, 0)))
    assert bslab.shape == (B_ROWS, WPAD)
    return wslab, bslab


@jax.jit
def text_encoder_forward(input_ids, attention_mask, embedding, wslab, bslab):
    ids2 = input_ids.reshape(BL, 1).astype(jnp.int32)
    keep = attention_mask.reshape(1, BL).astype(jnp.float32)
    # combined additive mask: padding keys + block-diagonal (no cross-sequence)
    addmask = jnp.asarray(_BLOCK_MASK) + (1.0 - keep) * NEG           # (BL, BL)

    vmem = pl.BlockSpec(memory_space=pltpu.MemorySpace.VMEM)
    out_full = pl.pallas_call(
        text_encoder_kernel,
        out_shape=jax.ShapeDtypeStruct((BL, WPAD), jnp.float32),      # lane-dense
        in_specs=[vmem, vmem, vmem, vmem, vmem],
        out_specs=vmem,
    )(ids2, addmask, embedding, wslab, bslab)

    # CLS row of every sequence, first NOUT lanes -> (B, NOUT)
    return out_full[::L, :NOUT]


def reference_forward(input_ids, attention_mask, p):
    """Pure-JAX reference (same math, exact softmax) for a correctness check."""
    x = jnp.take(p["embedding"], input_ids.reshape(-1), axis=0)       # (BL, H)
    neg = (1.0 - attention_mask.astype(jnp.float32)) * NEG            # (B, L)

    def ln(t, g, bb):
        mu = t.mean(-1, keepdims=True)
        var = ((t - mu) ** 2).mean(-1, keepdims=True)
        return (t - mu) * jax.lax.rsqrt(var + 1e-12) * g + bb

    q = x @ p["wq"] + p["bq"]
    k = x @ p["wk"] + p["bk"]
    v = x @ p["wv"] + p["bv"]
    rows = []
    for b in range(B):
        r = slice(b * L, (b + 1) * L)
        heads = []
        for h in range(NHEAD):
            c = slice(h * DHEAD, (h + 1) * DHEAD)
            s = (q[r, c] @ k[r, c].T) * (float(DHEAD) ** -0.5) + neg[b][None, :]
            heads.append(jax.nn.softmax(s, axis=-1) @ v[r, c])
        rows.append(jnp.concatenate(heads, axis=1))
    ctx = jnp.concatenate(rows, axis=0)
    h1 = ln(x + ctx @ p["wo"] + p["bo"], p["ln1g"], p["ln1b"])
    ff = jax.nn.gelu(h1 @ p["w1"] + p["b1"], approximate=False)
    h2 = ln(h1 + ff @ p["w2"] + p["b2"], p["ln2g"], p["ln2b"])
    return h2[::L, :] @ p["wlin"] + p["blin"]


if __name__ == "__main__":
    key = jax.random.PRNGKey(0)
    k_ids, k_params = jax.random.split(key)

    input_ids = jax.random.randint(k_ids, (B, L), 0, VOCAB, dtype=jnp.int32)
    # pad out the tail of the second sequence to exercise the mask path
    attention_mask = jnp.ones((B, L), jnp.int32).at[1, L - 2:].set(0)

    params = init_params(k_params)
    wslab, bslab = pack_params(params)

    out = text_encoder_forward(input_ids, attention_mask,
                               params["embedding"], wslab, bslab)
    out = jax.block_until_ready(out)
    assert out.shape == (B, NOUT) and out.dtype == jnp.float32

    # sanity check against a pure-JAX reference (loose tol: approx reciprocal
    # in softmax + polynomial erf are documented, tiny deviations)
    with jax.default_matmul_precision("highest"):
        ref = jax.block_until_ready(
            reference_forward(input_ids, attention_mask, params))
    np.testing.assert_allclose(np.asarray(out), np.asarray(ref),
                               rtol=5e-2, atol=1e-2)

    print("KERNEL_OK")
</pallas_src>

<mosaic_0001>
module attributes {stable_mosaic.version = 11 : i64} {
  func.func @text_encoder_kernel(%arg0: memref<16x1xi32, #tpu.memory_space<vmem>>, %arg1: memref<16x16xf32, #tpu.memory_space<vmem>>, %arg2: memref<64x32xf32, #tpu.memory_space<vmem>>, %arg3: memref<192x128xf32, #tpu.memory_space<vmem>>, %arg4: memref<16x128xf32, #tpu.memory_space<vmem>>, %arg5: memref<16x128xf32, #tpu.memory_space<vmem>>) attributes {dimension_semantics = [], scalar_prefetch = 0 : i64, scratch_operands = 0 : i64, tpu.core_type = #tpu.core_type<tc>} {
    %c0 = arith.constant 0 : index
    %c0_0 = arith.constant 0 : index
    %0 = vector.load %arg0[%c0, %c0_0] : memref<16x1xi32, #tpu.memory_space<vmem>>, vector<16x1xi32>
    %1 = tpu.iota {dimensions = array<i32: 1>} : vector<16x64xi32>
    %2 = vector.broadcast %0 : vector<16x1xi32> to vector<16x64xi32>
    %3 = arith.cmpi eq, %1, %2 : vector<16x64xi32>
    %cst = arith.constant 1.000000e+00 : f32
    %cst_1 = arith.constant 0.000000e+00 : f32
    %4 = vector.broadcast %cst : f32 to vector<16x64xf32>
    %5 = vector.broadcast %cst_1 : f32 to vector<16x64xf32>
    %6 = arith.select %3, %4, %5 : vector<16x64xi1>, vector<16x64xf32>
    %c0_2 = arith.constant 0 : index
    %c0_3 = arith.constant 0 : index
    %7 = vector.load %arg2[%c0_2, %c0_3] : memref<64x32xf32, #tpu.memory_space<vmem>>, vector<64x32xf32>
    %cst_4 = arith.constant dense<0.000000e+00> : vector<16x32xf32>
    %8 = tpu.matmul %6, %7, %cst_4 {dimension_numbers = #tpu.dot_dimension_numbers<[1], [0], [0], [1], [0, 0, 1, 1], [], []>} : vector<16x64xf32>, vector<64x32xf32>, vector<16x32xf32> -> vector<16x32xf32>
    %c0_5 = arith.constant 0 : index
    %c0_6 = arith.constant 0 : index
    %9 = vector.load %arg1[%c0_5, %c0_6] : memref<16x16xf32, #tpu.memory_space<vmem>>, vector<16x16xf32>
    %c0_7 = arith.constant 0 : index
    %c0_8 = arith.constant 0 : index
    %10 = vector.load %arg3[%c0_7, %c0_8] : memref<192x128xf32, #tpu.memory_space<vmem>>, vector<32x96xf32>
    %c0_9 = arith.constant 0 : index
    %c0_10 = arith.constant 0 : index
    %11 = vector.load %arg4[%c0_9, %c0_10] : memref<16x128xf32, #tpu.memory_space<vmem>>, vector<1x96xf32>
    %cst_11 = arith.constant dense<0.000000e+00> : vector<16x96xf32>
    %12 = tpu.matmul %8, %10, %cst_11 {dimension_numbers = #tpu.dot_dimension_numbers<[1], [0], [0], [1], [0, 0, 1, 1], [], []>} : vector<16x32xf32>, vector<32x96xf32>, vector<16x96xf32> -> vector<16x96xf32>
    %13 = vector.broadcast %11 : vector<1x96xf32> to vector<16x96xf32>
    %14 = arith.addf %12, %13 : vector<16x96xf32>
    %cst_12 = arith.constant 0.000000e+00 : f32
    %15 = vector.broadcast %cst_12 : f32 to vector<16x32xf32>
    %16 = vector.extract_strided_slice %14 {offsets = [0, 0], sizes = [16, 16], strides = [1, 1]} : vector<16x96xf32> to vector<16x16xf32>
    %17 = vector.extract_strided_slice %14 {offsets = [0, 32], sizes = [16, 16], strides = [1, 1]} : vector<16x96xf32> to vector<16x16xf32>
    %18 = vector.extract_strided_slice %14 {offsets = [0, 64], sizes = [16, 16], strides = [1, 1]} : vector<16x96xf32> to vector<16x16xf32>
    %cst_13 = arith.constant dense<0.000000e+00> : vector<16x16xf32>
    %19 = tpu.matmul %16, %17, %cst_13 {dimension_numbers = #tpu.dot_dimension_numbers<[1], [1], [0], [0], [0, 0, 1, 0], [], []>} : vector<16x16xf32>, vector<16x16xf32>, vector<16x16xf32> -> vector<16x16xf32>
    %cst_14 = arith.constant 2.500000e-01 : f32
    %20 = vector.broadcast %cst_14 : f32 to vector<16x16xf32>
    %21 = arith.mulf %19, %20 : vector<16x16xf32>
    %22 = arith.addf %21, %9 : vector<16x16xf32>
    %cst_15 = arith.constant dense<0xFF800000> : vector<16xf32>
    %23 = vector.multi_reduction <maximumf>, %22, %cst_15 [1] : vector<16x16xf32> to vector<16xf32>
    %24 = vector.shape_cast %23 : vector<16xf32> to vector<16x1xf32>
    %25 = vector.broadcast %24 : vector<16x1xf32> to vector<16x16xf32>
    %26 = arith.subf %22, %25 : vector<16x16xf32>
    %27 = math.exp %26 : vector<16x16xf32>
    %cst_16 = arith.constant dense<0.000000e+00> : vector<16xf32>
    %28 = vector.multi_reduction <add>, %27, %cst_16 [1] : vector<16x16xf32> to vector<16xf32>
    %29 = vector.shape_cast %28 : vector<16xf32> to vector<16x1xf32>
    %30 = tpu.reciprocal %29 {approx = true} : vector<16x1xf32> -> vector<16x1xf32>
    %31 = vector.broadcast %30 : vector<16x1xf32> to vector<16x16xf32>
    %32 = arith.mulf %27, %31 : vector<16x16xf32>
    %cst_17 = arith.constant dense<0.000000e+00> : vector<16x16xf32>
    %33 = tpu.matmul %32, %18, %cst_17 {dimension_numbers = #tpu.dot_dimension_numbers<[1], [0], [0], [1], [0, 0, 1, 1], [], []>} : vector<16x16xf32>, vector<16x16xf32>, vector<16x16xf32> -> vector<16x16xf32>
    %c32 = arith.constant 32 : index
    %c0_18 = arith.constant 0 : index
    %34 = vector.load %arg3[%c32, %c0_18] : memref<192x128xf32, #tpu.memory_space<vmem>>, vector<16x32xf32>
    %cst_19 = arith.constant dense<0.000000e+00> : vector<16x32xf32>
    %35 = tpu.matmul %33, %34, %cst_19 {dimension_numbers = #tpu.dot_dimension_numbers<[1], [0], [0], [1], [0, 0, 1, 1], [], []>} : vector<16x16xf32>, vector<16x32xf32>, vector<16x32xf32> -> vector<16x32xf32>
    %36 = arith.addf %15, %35 : vector<16x32xf32>
    %37 = vector.extract_strided_slice %14 {offsets = [0, 16], sizes = [16, 16], strides = [1, 1]} : vector<16x96xf32> to vector<16x16xf32>
    %38 = vector.extract_strided_slice %14 {offsets = [0, 48], sizes = [16, 16], strides = [1, 1]} : vector<16x96xf32> to vector<16x16xf32>
    %39 = vector.extract_strided_slice %14 {offsets = [0, 80], sizes = [16, 16], strides = [1, 1]} : vector<16x96xf32> to vector<16x16xf32>
    %cst_20 = arith.constant dense<0.000000e+00> : vector<16x16xf32>
    %40 = tpu.matmul %37, %38, %cst_20 {dimension_numbers = #tpu.dot_dimension_numbers<[1], [1], [0], [0], [0, 0, 1, 0], [], []>} : vector<16x16xf32>, vector<16x16xf32>, vector<16x16xf32> -> vector<16x16xf32>
    %cst_21 = arith.constant 2.500000e-01 : f32
    %41 = vector.broadcast %cst_21 : f32 to vector<16x16xf32>
    %42 = arith.mulf %40, %41 : vector<16x16xf32>
    %43 = arith.addf %42, %9 : vector<16x16xf32>
    %cst_22 = arith.constant dense<0xFF800000> : vector<16xf32>
    %44 = vector.multi_reduction <maximumf>, %43, %cst_22 [1] : vector<16x16xf32> to vector<16xf32>
    %45 = vector.shape_cast %44 : vector<16xf32> to vector<16x1xf32>
    %46 = vector.broadcast %45 : vector<16x1xf32> to vector<16x16xf32>
    %47 = arith.subf %43, %46 : vector<16x16xf32>
    %48 = math.exp %47 : vector<16x16xf32>
    %cst_23 = arith.constant dense<0.000000e+00> : vector<16xf32>
    %49 = vector.multi_reduction <add>, %48, %cst_23 [1] : vector<16x16xf32> to vector<16xf32>
    %50 = vector.shape_cast %49 : vector<16xf32> to vector<16x1xf32>
    %51 = tpu.reciprocal %50 {approx = true} : vector<16x1xf32> -> vector<16x1xf32>
    %52 = vector.broadcast %51 : vector<16x1xf32> to vector<16x16xf32>
    %53 = arith.mulf %48, %52 : vector<16x16xf32>
    %cst_24 = arith.constant dense<0.000000e+00> : vector<16x16xf32>
    %54 = tpu.matmul %53, %39, %cst_24 {dimension_numbers = #tpu.dot_dimension_numbers<[1], [0], [0], [1], [0, 0, 1, 1], [], []>} : vector<16x16xf32>, vector<16x16xf32>, vector<16x16xf32> -> vector<16x16xf32>
    %c48 = arith.constant 48 : index
    %c0_25 = arith.constant 0 : index
    %55 = vector.load %arg3[%c48, %c0_25] : memref<192x128xf32, #tpu.memory_space<vmem>>, vector<16x32xf32>
    %cst_26 = arith.constant dense<0.000000e+00> : vector<16x32xf32>
    %56 = tpu.matmul %54, %55, %cst_26 {dimension_numbers = #tpu.dot_dimension_numbers<[1], [0], [0], [1], [0, 0, 1, 1], [], []>} : vector<16x16xf32>, vector<16x32xf32>, vector<16x32xf32> -> vector<16x32xf32>
    %57 = arith.addf %36, %56 : vector<16x32xf32>
    %c1 = arith.constant 1 : index
    %c0_27 = arith.constant 0 : index
    %58 = vector.load %arg4[%c1, %c0_27] : memref<16x128xf32, #tpu.memory_space<vmem>>, vector<1x32xf32>
    %59 = vector.broadcast %58 : vector<1x32xf32> to vector<16x32xf32>
    %60 = arith.addf %57, %59 : vector<16x32xf32>
    %61 = arith.addf %8, %60 : vector<16x32xf32>
    %c2 = arith.constant 2 : index
    %c0_28 = arith.constant 0 : index
    %62 = vector.load %arg4[%c2, %c0_28] : memref<16x128xf32, #tpu.memory_space<vmem>>, vector<1x32xf32>
    %c3 = arith.constant 3 : index
    %c0_29 = arith.constant 0 : index
    %63 = vector.load %arg4[%c3, %c0_29] : memref<16x128xf32, #tpu.memory_space<vmem>>, vector<1x32xf32>
    %cst_30 = arith.constant dense<0.000000e+00> : vector<16xf32>
    %64 = vector.multi_reduction <add>, %61, %cst_30 [1] : vector<16x32xf32> to vector<16xf32>
    %65 = vector.shape_cast %64 : vector<16xf32> to vector<16x1xf32>
    %cst_31 = arith.constant 3.200000e+01 : f32
    %66 = vector.broadcast %cst_31 : f32 to vector<16x1xf32>
    %67 = arith.divf %65, %66 : vector<16x1xf32>
    %68 = vector.broadcast %67 : vector<16x1xf32> to vector<16x32xf32>
    %69 = arith.subf %61, %68 : vector<16x32xf32>
    %70 = arith.mulf %69, %69 : vector<16x32xf32>
    %cst_32 = arith.constant dense<0.000000e+00> : vector<16xf32>
    %71 = vector.multi_reduction <add>, %70, %cst_32 [1] : vector<16x32xf32> to vector<16xf32>
    %72 = vector.shape_cast %71 : vector<16xf32> to vector<16x1xf32>
    %cst_33 = arith.constant 3.200000e+01 : f32
    %73 = vector.broadcast %cst_33 : f32 to vector<16x1xf32>
    %74 = arith.divf %72, %73 : vector<16x1xf32>
    %75 = vector.broadcast %67 : vector<16x1xf32> to vector<16x32xf32>
    %76 = arith.subf %61, %75 : vector<16x32xf32>
    %cst_34 = arith.constant 9.99999996E-13 : f32
    %77 = vector.broadcast %cst_34 : f32 to vector<16x1xf32>
    %78 = arith.addf %74, %77 : vector<16x1xf32>
    %79 = math.rsqrt %78 : vector<16x1xf32>
    %80 = vector.broadcast %79 : vector<16x1xf32> to vector<16x32xf32>
    %81 = arith.mulf %76, %80 : vector<16x32xf32>
    %82 = vector.broadcast %62 : vector<1x32xf32> to vector<16x32xf32>
    %83 = arith.mulf %81, %82 : vector<16x32xf32>
    %84 = vector.broadcast %63 : vector<1x32xf32> to vector<16x32xf32>
    %85 = arith.addf %83, %84 : vector<16x32xf32>
    %c64 = arith.constant 64 : index
    %c0_35 = arith.constant 0 : index
    %86 = vector.load %arg3[%c64, %c0_35] : memref<192x128xf32, #tpu.memory_space<vmem>>, vector<32x64xf32>
    %cst_36 = arith.constant dense<0.000000e+00> : vector<16x64xf32>
    %87 = tpu.matmul %85, %86, %cst_36 {dimension_numbers = #tpu.dot_dimension_numbers<[1], [0], [0], [1], [0, 0, 1, 1], [], []>} : vector<16x32xf32>, vector<32x64xf32>, vector<16x64xf32> -> vector<16x64xf32>
    %c4 = arith.constant 4 : index
    %c0_37 = arith.constant 0 : index
    %88 = vector.load %arg4[%c4, %c0_37] : memref<16x128xf32, #tpu.memory_space<vmem>>, vector<1x64xf32>
    %89 = vector.broadcast %88 : vector<1x64xf32> to vector<16x64xf32>
    %90 = arith.addf %87, %89 : vector<16x64xf32>
    %cst_38 = arith.constant 5.000000e-01 : f32
    %91 = vector.broadcast %cst_38 : f32 to vector<16x64xf32>
    %92 = arith.mulf %91, %90 : vector<16x64xf32>
    %cst_39 = arith.constant 0.707106769 : f32
    %93 = vector.broadcast %cst_39 : f32 to vector<16x64xf32>
    %94 = arith.mulf %90, %93 : vector<16x64xf32>
    %cst_40 = arith.constant 0.000000e+00 : f32
    %95 = vector.broadcast %cst_40 : f32 to vector<16x64xf32>
    %96 = arith.cmpf oge, %94, %95 : vector<16x64xf32>
    %cst_41 = arith.constant 1.000000e+00 : f32
    %cst_42 = arith.constant -1.000000e+00 : f32
    %97 = vector.broadcast %cst_41 : f32 to vector<16x64xf32>
    %98 = vector.broadcast %cst_42 : f32 to vector<16x64xf32>
    %99 = arith.select %96, %97, %98 : vector<16x64xi1>, vector<16x64xf32>
    %100 = math.absf %94 : vector<16x64xf32>
    %cst_43 = arith.constant 0.327591091 : f32
    %101 = vector.broadcast %cst_43 : f32 to vector<16x64xf32>
    %102 = arith.mulf %101, %100 : vector<16x64xf32>
    %cst_44 = arith.constant 1.000000e+00 : f32
    %103 = vector.broadcast %cst_44 : f32 to vector<16x64xf32>
    %104 = arith.addf %103, %102 : vector<16x64xf32>
    %cst_45 = arith.constant 1.000000e+00 : f32
    %105 = vector.broadcast %cst_45 : f32 to vector<16x64xf32>
    %106 = arith.divf %105, %104 : vector<16x64xf32>
    %cst_46 = arith.constant 1.06140542 : f32
    %107 = vector.broadcast %cst_46 : f32 to vector<16x64xf32>
    %108 = arith.mulf %107, %106 : vector<16x64xf32>
    %cst_47 = arith.constant -1.45315206 : f32
    %109 = vector.broadcast %cst_47 : f32 to vector<16x64xf32>
    %110 = arith.addf %108, %109 : vector<16x64xf32>
    %111 = arith.mulf %110, %106 : vector<16x64xf32>
    %cst_48 = arith.constant 1.42141378 : f32
    %112 = vector.broadcast %cst_48 : f32 to vector<16x64xf32>
    %113 = arith.addf %111, %112 : vector<16x64xf32>
    %114 = arith.mulf %113, %106 : vector<16x64xf32>
    %cst_49 = arith.constant -0.284496725 : f32
    %115 = vector.broadcast %cst_49 : f32 to vector<16x64xf32>
    %116 = arith.addf %114, %115 : vector<16x64xf32>
    %117 = arith.mulf %116, %106 : vector<16x64xf32>
    %cst_50 = arith.constant 0.254829586 : f32
    %118 = vector.broadcast %cst_50 : f32 to vector<16x64xf32>
    %119 = arith.addf %117, %118 : vector<16x64xf32>
    %120 = arith.mulf %119, %106 : vector<16x64xf32>
    %cst_51 = arith.constant 0.000000e+00 : f32
    %121 = vector.broadcast %cst_51 : f32 to vector<16x64xf32>
    %122 = arith.subf %121, %100 : vector<16x64xf32>
    %123 = arith.mulf %122, %100 : vector<16x64xf32>
    %124 = math.exp %123 : vector<16x64xf32>
    %125 = arith.mulf %120, %124 : vector<16x64xf32>
    %cst_52 = arith.constant 1.000000e+00 : f32
    %126 = vector.broadcast %cst_52 : f32 to vector<16x64xf32>
    %127 = arith.subf %126, %125 : vector<16x64xf32>
    %128 = arith.mulf %99, %127 : vector<16x64xf32>
    %cst_53 = arith.constant 1.000000e+00 : f32
    %129 = vector.broadcast %cst_53 : f32 to vector<16x64xf32>
    %130 = arith.addf %129, %128 : vector<16x64xf32>
    %131 = arith.mulf %92, %130 : vector<16x64xf32>
    %c96 = arith.constant 96 : index
    %c0_54 = arith.constant 0 : index
    %132 = vector.load %arg3[%c96, %c0_54] : memref<192x128xf32, #tpu.memory_space<vmem>>, vector<64x32xf32>
    %cst_55 = arith.constant dense<0.000000e+00> : vector<16x32xf32>
    %133 = tpu.matmul %131, %132, %cst_55 {dimension_numbers = #tpu.dot_dimension_numbers<[1], [0], [0], [1], [0, 0, 1, 1], [], []>} : vector<16x64xf32>, vector<64x32xf32>, vector<16x32xf32> -> vector<16x32xf32>
    %c5 = arith.constant 5 : index
    %c0_56 = arith.constant 0 : index
    %134 = vector.load %arg4[%c5, %c0_56] : memref<16x128xf32, #tpu.memory_space<vmem>>, vector<1x32xf32>
    %135 = vector.broadcast %134 : vector<1x32xf32> to vector<16x32xf32>
    %136 = arith.addf %133, %135 : vector<16x32xf32>
    %137 = arith.addf %85, %136 : vector<16x32xf32>
    %c6 = arith.constant 6 : index
    %c0_57 = arith.constant 0 : index
    %138 = vector.load %arg4[%c6, %c0_57] : memref<16x128xf32, #tpu.memory_space<vmem>>, vector<1x32xf32>
    %c7 = arith.constant 7 : index
    %c0_58 = arith.constant 0 : index
    %139 = vector.load %arg4[%c7, %c0_58] : memref<16x128xf32, #tpu.memory_space<vmem>>, vector<1x32xf32>
    %cst_59 = arith.constant dense<0.000000e+00> : vector<16xf32>
    %140 = vector.multi_reduction <add>, %137, %cst_59 [1] : vector<16x32xf32> to vector<16xf32>
    %141 = vector.shape_cast %140 : vector<16xf32> to vector<16x1xf32>
    %cst_60 = arith.constant 3.200000e+01 : f32
    %142 = vector.broadcast %cst_60 : f32 to vector<16x1xf32>
    %143 = arith.divf %141, %142 : vector<16x1xf32>
    %144 = vector.broadcast %143 : vector<16x1xf32> to vector<16x32xf32>
    %145 = arith.subf %137, %144 : vector<16x32xf32>
    %146 = arith.mulf %145, %145 : vector<16x32xf32>
    %cst_61 = arith.constant dense<0.000000e+00> : vector<16xf32>
    %147 = vector.multi_reduction <add>, %146, %cst_61 [1] : vector<16x32xf32> to vector<16xf32>
    %148 = vector.shape_cast %147 : vector<16xf32> to vector<16x1xf32>
    %cst_62 = arith.constant 3.200000e+01 : f32
    %149 = vector.broadcast %cst_62 : f32 to vector<16x1xf32>
    %150 = arith.divf %148, %149 : vector<16x1xf32>
    %151 = vector.broadcast %143 : vector<16x1xf32> to vector<16x32xf32>
    %152 = arith.subf %137, %151 : vector<16x32xf32>
    %cst_63 = arith.constant 9.99999996E-13 : f32
    %153 = vector.broadcast %cst_63 : f32 to vector<16x1xf32>
    %154 = arith.addf %150, %153 : vector<16x1xf32>
    %155 = math.rsqrt %154 : vector<16x1xf32>
    %156 = vector.broadcast %155 : vector<16x1xf32> to vector<16x32xf32>
    %157 = arith.mulf %152, %156 : vector<16x32xf32>
    %158 = vector.broadcast %138 : vector<1x32xf32> to vector<16x32xf32>
    %159 = arith.mulf %157, %158 : vector<16x32xf32>
    %160 = vector.broadcast %139 : vector<1x32xf32> to vector<16x32xf32>
    %161 = arith.addf %159, %160 : vector<16x32xf32>
    %c160 = arith.constant 160 : index
    %c0_64 = arith.constant 0 : index
    %162 = vector.load %arg3[%c160, %c0_64] : memref<192x128xf32, #tpu.memory_space<vmem>>, vector<32x128xf32>
    %cst_65 = arith.constant dense<0.000000e+00> : vector<16x128xf32>
    %163 = tpu.matmul %161, %162, %cst_65 {dimension_numbers = #tpu.dot_dimension_numbers<[1], [0], [0], [1], [0, 0, 1, 1], [], []>} : vector<16x32xf32>, vector<32x128xf32>, vector<16x128xf32> -> vector<16x128xf32>
    %c8 = arith.constant 8 : index
    %c0_66 = arith.constant 0 : index
    %164 = vector.load %arg4[%c8, %c0_66] : memref<16x128xf32, #tpu.memory_space<vmem>>, vector<1x128xf32>
    %165 = vector.broadcast %164 : vector<1x128xf32> to vector<16x128xf32>
    %166 = arith.addf %163, %165 : vector<16x128xf32>
    %c0_67 = arith.constant 0 : index
    %c0_68 = arith.constant 0 : index
    %167 = vector.load %arg5[%c0_67, %c0_68] : memref<16x128xf32, #tpu.memory_space<vmem>>, vector<16x128xf32>
    tpu.vector_store %arg5[%c0_67, %c0_68], %166 {strides = array<i32>} : memref<16x128xf32, #tpu.memory_space<vmem>>, vector<16x128xf32>,
    return
  }
}

</mosaic_0001>

<bundles_post_ra>
// kernel: text_encoder_forward.1
= control target key start
LH: loop header
LB: loop body
LE: loop exit
PB: predicated region body
PF: predicated region fallthrough
CT: control target
= control target key end

     0   :  { %10 = vsyncpa [#allocation3], 0  ;;  %s820_s21 = smov [#allocation2]   ;;  %s821_s23 = smov 128   ;;  %s1020_s0 = inlined_call_operand.vmem [shape: s32[16,1], index: 0, kind: input, shape index: {}]   ;;  %s1021_s1 = inlined_call_operand.vmem [shape: f32[16,16], index: 1, kind: input, shape index: {}]   ;;  %s1022_s2 = inlined_call_operand.vmem [shape: f32[64,32], index: 2, kind: input, shape index: {}]   ;;  %s1023_s3 = inlined_call_operand.hbm [shape: f32[192,128], index: 3, kind: input, shape index: {}]   ;;  %s1024_s4 = inlined_call_operand.vmem [shape: f32[16,128], index: 4, kind: input, shape index: {}]   ;;  %s1025_s5 = inlined_call_operand.vmem [shape: f32[16,128], index: 5, kind: output, shape index: {}]  }
   0x1   :  { %s21_s20 = sshll.u32 %s1023_s3, 4  ;;  %s23_s22 = sshll.u32 %s820_s21, 4  ;;  %s22_s20 = int_to_ptr.hbm [resolvable:$true] %s21_s20  ;;  %s24_s22 = int_to_ptr.vmem [resolvable:$true] %s23_s22 }
   0x2   :  { %s822_s24 = smov 8  }
   0x3   :  { %29 = dma.hbm_to_vmem [thread:$0]  %s22_s20, 3072, %s24_s22, [#allocation3], %s821_s23, %s821_s23, %s822_s24  }
   0x4   :  { %818 = dma.done.wait [#allocation3], 3072  }
   0x5   :  { %819 = vsyncadd [#allocation3], 4294964224  ;;  %v823_v0 = vmov 0   ;;  %v36_v1 = vld [vmem:[%s1020_s0] sm:$0xff]  ;;  %v57_v2 = vld [vmem:[%s1022_s2 + $0x38] sm:$0xff]  ;;  %v38_v14 = vlaneseq  ;;  %vm58_vm0 = vcmask 523264  }
   0x6   :  { %740 = vset.pattern.permute.xlu0 %v823_v0  ;;  %73 = vmatpush.msra.mxu0 %v57_v2  ;;  %v56_v3 = vld [vmem:[%s1022_s2 + $0x30] sm:$0xff]  ;;  %v55_v4 = vld [vmem:[%s1022_s2 + $0x28] sm:$0xff]  ;;  %v54_v5 = vld [vmem:[%s1022_s2 + $0x20] sm:$0xff]  ;;  %v824_v17 = vmov 0.0   ;;  %vm96_vm3 = vcmask 261120   ;;  %s825_s19 = smov 96  }
   0x7   :  { %41 = vperm.xlu0 %740, %v36_v1   ;;  %v37_v6 = vld [vmem:[%s1020_s0 + $0x8] sm:$0xff]  ;;  %v53_v7 = vld [vmem:[%s1022_s2 + $0x18] sm:$0xff]  ;;  %v52_v8 = vld [vmem:[%s1022_s2 + $0x10] sm:$0xff]  ;;  %v39_v15 = vand.u32 127, %v38_v14  ;;  %s826_s20 = smov 64   ;;  %s827_s21 = smov 80  }
   0x8   :  { %74 = vmatpush.msra.mxu0 %v56_v3  ;;  %v51_v9 = vld [vmem:[%s1022_s2 + $0x8] sm:$0xff]  ;;  %v50_v10 = vld [vmem:[%s1022_s2] sm:$0xff]  ;;  %v93_v11 = vld [vmem:[#allocation2 + $0x18] sm:$0xff]  ;;  %s828_s22 = smov 112   ;;  %vm132_vm4 = vcmask 130048  }
   0x9   :  { %v92_v12 = vld [vmem:[#allocation2 + $0x10] sm:$0xff]  ;;  %115 = vmatpush.msra.mxu1 %v93_v11  ;;  %v91_v13 = vld [vmem:[#allocation2 + $0x8] sm:$0xff]  ;;  %v90_v21 = vld [vmem:[#allocation2] sm:$0xff] }
   0xa   :  { %75 = vmatpush.msra.mxu0 %v55_v4  ;;  %v751_v25 = vld [vmem:[%s1024_s4] ss:$0 sm:$0xff]  ;;  %v89_v42 = vld [vmem:[%s1021_s1 + $0x8] sm:$0xff] }
   0xb   :  { %116 = vmatpush.msra.mxu1 %v92_v12  ;;  %v88_v37 = vld [vmem:[%s1021_s1] sm:$0xff]  ;;  %s829_s1 = smov 48   ;;  %v226_v57 = vld [vmem:[#allocation2 + $0x28] sm:$0xff] }
   0xc   :  { %76 = vmatpush.msra.mxu0 %v54_v5  ;;  %v225_v5 = vld [vmem:[#allocation2 + $0x20] sm:$0xff] }
   0xd   :  { %117 = vmatpush.msra.mxu1 %v91_v13 }
   0xe   :  { %77 = vmatpush.msra.mxu0 %v53_v7 }
   0xf   :  { %44 = vperm.xlu0 %740, %v37_v6   ;;  %118 = vmatpush.msra.mxu1 %v90_v21 }
  0x10   :  { %78 = vmatpush.msra.mxu0 %v52_v8 }
  0x12   :  { %79 = vmatpush.msra.mxu0 %v51_v9 }
  0x14   :  { %80 = vmatpush.msra.mxu0 %v50_v10 }
  0x16   :  { %378 = vmatpush.msrb.mxu0 %v226_v57 }
  0x18   :  { %379 = vmatpush.msrb.mxu0 %v225_v5  ;;  %v452_v5 = vld [vmem:[#allocation2 + $0x40] sm:$0xff] }
  0x79   :  { %v42_v16 = vpop.permute.xlu0 %41 }
  0x7a   :  { %vm46_vm1 = vcmp.eq.s32.totalorder %v39_v15, %v42_v16 }
  0x7b   :  { %v48_v18 = vsel %vm46_vm1, 1.0, %v824_v17 }
  0x7c   :  { %702 = vmatmul.msk.f32.vlgmr.msra.gmra.mxu0 %vm58_vm0, %v48_v18 }
  0x81   :  { %v45_v19 = vpop.permute.xlu0 %44 }
  0x82   :  { %vm47_vm2 = vcmp.eq.s32.totalorder %v39_v15, %v45_v19 }
  0x83   :  { %v49_v20 = vsel %vm47_vm2, 1.0, %v824_v17 }
  0x84   :  { %703 = vmatmul.msk.f32.gmra.mxu0 %vm58_vm0, %v49_v20 }
  0xf9   :  { %v897_v22 = vpop.f32.mrf.mxu0 }
  0xfa   :  { %704 = vmatmul.msk.f32.vlgmr.msra.gmra.mxu1 %vm96_vm3, %v897_v22 }
 0x101   :  { %v901_v23 = vpop.f32.mrf.mxu0 }
 0x102   :  { %705 = vmatmul.msk.f32.gmra.mxu1 %vm96_vm3, %v901_v23 }
 0x177   :  { %v120_v24 = vpop.f32.mrf.mxu1 }
 0x178   :  { %v121_v28 = vadd.f32 %v751_v25, %v120_v24 }
 0x17f   :  { %v123_v26 = vpop.f32.mrf.mxu1 }
 0x180   :  { %v124_v27 = vadd.f32 %v751_v25, %v123_v26 }
 0x182   :  { %130 = vrot.lane.b32.xlu1 %v124_v27, %s825_s19  ;;  %v741_v29 = vpack.i.bf16 %v121_v28, %v124_v27 }
 0x18a   :  { %128 = vrot.lane.b32.xlu1 %v121_v28, %s825_s19 }
 0x192   :  { %742 = vrot.lane.b32.xlu1 %v741_v29, %s826_s20 }
 0x19a   :  { %233 = vrot.lane.b32.xlu1 %v124_v27, %s827_s21 }
 0x1a2   :  { %227 = vrot.lane.b32.xlu1 %v121_v28, %s828_s22 }
 0x1aa   :  { %229 = vrot.lane.b32.xlu1 %v124_v27, %s828_s22 }
 0x1f4   :  { %v131_v30 = vpop.permute.xlu1 %130 }
 0x1f5   :  { %706 = vmatpush.xpose.msk.msra.mxu2 %vm132_vm4, %v131_v30 }
 0x1fc   :  { %v129_v31 = vpop.permute.xlu1 %128 }
 0x1fd   :  { %707 = vmatpush.xpose.msk.msra.mxu2 %vm132_vm4, %v129_v31 }
 0x200   :  { %708 = vmatmul.msk.f32.vlgmr.msra.gmra.mxu2 %vm132_vm4, %v121_v28 }
 0x204   :  { %v743_v32 = vpop.permute.xlu1 %742 }
 0x205   :  { %v744_v33 = vunpack.i.l.bf16 %v743_v32  ;;  %v745_v34 = vunpack.i.h.bf16 %v743_v32 }
 0x207   :  { %216 = vmatpush.msra.mxu3 %v744_v33 }
 0x208   :  { %709 = vmatmul.msk.f32.gmra.mxu2 %vm132_vm4, %v124_v27 }
 0x209   :  { %217 = vmatpush.msra.mxu3 %v745_v34 }
 0x20c   :  { %v234_v35 = vpop.permute.xlu1 %233 }
 0x20d   :  { %712 = vmatpush.xpose.msk.msrb.mxu3 %vm132_vm4, %v234_v35 }
 0x214   :  { %v228_v3 = vpop.permute.xlu1 %227 }
 0x21c   :  { %v230_v4 = vpop.permute.xlu1 %229 }
 0x283   :  { %v158_v36 = vpop.f32.mrf.mxu2 }
 0x284   :  { %v164_v38 = vmul.f32 0.25, %v158_v36 }
 0x286   :  { %v166_v39 = vadd.f32 %v164_v38, %v88_v37 }
 0x288   :  { %v168_v40 = vsel %vm132_vm4, %v166_v39, -inf }
 0x289   :  { %169 = vmax.xlane.f32.xlu2 %v168_v40 }
 0x28b   :  { %v161_v41 = vpop.f32.mrf.mxu2 }
 0x28c   :  { %v165_v43 = vmul.f32 0.25, %v161_v41 }
 0x28e   :  { %v167_v44 = vadd.f32 %v165_v43, %v89_v42 }
 0x290   :  { %v171_v45 = vsel %vm132_vm4, %v167_v44, -inf }
 0x291   :  { %172 = vmax.xlane.f32.xlu2 %v171_v45 }
 0x2fc   :  { %v170_v46 = vpop.xlane.xlu2 %169 }
 0x2fd   :  { %v174_v47 = vsub.f32 %v166_v39, %v170_v46  ;;  %v752_v39 = vld [vmem:[%s1024_s4 + $0x1] ss:$0 sm:$0xff] }
 0x2ff   :  { %v176_v48 = vmul.f32 1.442695, %v174_v47 }
 0x301   :  { %760 = vpow2.f32 %v176_v48 }
 0x304   :  { %v173_v49 = vpop.xlane.xlu2 %172 }
 0x305   :  { %v175_v50 = vsub.f32 %v167_v44, %v173_v49 }
 0x307   :  { %v761_v51 = vpop.eup %760  ;;  %v178_v52 = vmul.f32 1.442695, %v175_v50 }
 0x308   :  { %v180_v53 = vsel %vm132_vm4, %v761_v51, 0.0 }
 0x309   :  { %762 = vpow2.f32 %v178_v52  ;;  %181 = vadd.xlane.f32.xlu0 %v180_v53 }
 0x30f   :  { %v763_v54 = vpop.eup %762 }
 0x310   :  { %v183_v55 = vsel %vm132_vm4, %v763_v54, 0.0 }
 0x311   :  { %184 = vadd.xlane.f32.xlu2 %v183_v55 }
 0x31d   :  { %747 = vrot.lane.b32.xlu0 %v741_v29, %s829_s1  ;;  %v327_v29 = vld [vmem:[#allocation2 + $0x30] sm:$0xff] }
 0x329   :  { %231 = vrot.lane.b32.xlu2 %v121_v28, %s827_s21  ;;  %v328_v28 = vld [vmem:[#allocation2 + $0x38] sm:$0xff] }
 0x32a   :  { %349 = vmatpush.msrb.mxu2 %v328_v28 }
 0x32c   :  { %350 = vmatpush.msrb.mxu2 %v327_v29 }
 0x37c   :  { %v182_v56 = vpop.xlane.xlu0 %181 }
 0x37d   :  { %764 = vrcp.f32 %v182_v56 }
 0x383   :  { %v765_v58 = vpop.eup %764 }
 0x384   :  { %v185_v59 = vpop.xlane.xlu2 %184  ;;  %v188_v60 = vmul.f32 %v765_v58, %v761_v51  ;;  %v830_v51 = vmov 32.0  }
 0x385   :  { %766 = vrcp.f32 %v185_v59 }
 0x386   :  { %710 = vmatmul.msk.f32.vlgmr.msra.gmra.mxu3 %vm132_vm4, %v188_v60 }
 0x38b   :  { %v767_v61 = vpop.eup %766 }
 0x38c   :  { %v232_v62 = vpop.permute.xlu2 %231  ;;  %v189_v63 = vmul.f32 %v767_v61, %v763_v54 }
 0x38d   :  { %713 = vmatpush.xpose.msk.msrb.mxu3 %vm132_vm4, %v232_v62 }
 0x38e   :  { %711 = vmatmul.msk.f32.gmra.mxu3 %vm132_vm4, %v189_v63 }
 0x38f   :  { %v748_v0 = vpop.permute.xlu0 %747 }
 0x390   :  { %v749_v1 = vunpack.i.l.bf16 %v748_v0  ;;  %v750_v2 = vunpack.i.h.bf16 %v748_v0 }
 0x392   :  { %318 = vmatpush.msrb.mxu1 %v749_v1 }
 0x394   :  { %319 = vmatpush.msrb.mxu1 %v750_v2  ;;  %v455_v2 = vld [vmem:[#allocation2 + $0x58] sm:$0xff] }
 0x395   :  { %476 = vmatpush.msra.mxu3 %v455_v2 }
 0x396   :  { %714 = vmatmul.msk.f32.vlgmr.msrb.gmra.mxu3 %vm132_vm4, %v228_v3  ;;  %v454_v3 = vld [vmem:[#allocation2 + $0x50] sm:$0xff] }
 0x397   :  { %477 = vmatpush.msra.mxu3 %v454_v3 }
 0x39e   :  { %715 = vmatmul.msk.f32.gmra.mxu3 %vm132_vm4, %v230_v4  ;;  %v453_v4 = vld [vmem:[#allocation2 + $0x48] sm:$0xff] }
 0x39f   :  { %478 = vmatpush.msra.mxu3 %v453_v4 }
 0x3a1   :  { %479 = vmatpush.msra.mxu3 %v452_v5 }
 0x409   :  { %v219_v6 = vpop.f32.mrf.mxu3 }
 0x40a   :  { %720 = vmatmul.msk.f32.vlgmr.msrb.gmra.mxu0 %vm132_vm4, %v219_v6 }
 0x411   :  { %v222_v7 = vpop.f32.mrf.mxu3 }
 0x412   :  { %721 = vmatmul.msk.f32.gmra.mxu0 %vm132_vm4, %v222_v7 }
 0x419   :  { %v260_v8 = vpop.f32.mrf.mxu3 }
 0x41a   :  { %v266_v9 = vmul.f32 0.25, %v260_v8 }
 0x41c   :  { %v268_v10 = vadd.f32 %v266_v9, %v88_v37 }
 0x41e   :  { %v270_v11 = vsel %vm132_vm4, %v268_v10, -inf }
 0x41f   :  { %271 = vmax.xlane.f32.xlu1 %v270_v11 }
 0x421   :  { %v263_v12 = vpop.f32.mrf.mxu3 }
 0x422   :  { %v267_v13 = vmul.f32 0.25, %v263_v12 }
 0x424   :  { %v269_v14 = vadd.f32 %v267_v13, %v89_v42 }
 0x426   :  { %v273_v15 = vsel %vm132_vm4, %v269_v14, -inf }
 0x427   :  { %274 = vmax.xlane.f32.xlu2 %v273_v15 }
 0x487   :  { %v381_v38 = vpop.f32.mrf.mxu0 }
 0x48f   :  { %v384_v45 = vpop.f32.mrf.mxu0 }
 0x492   :  { %v272_v16 = vpop.xlane.xlu1 %271 }
 0x493   :  { %v276_v17 = vsub.f32 %v268_v10, %v272_v16 }
 0x495   :  { %v278_v18 = vmul.f32 1.442695, %v276_v17 }
 0x497   :  { %768 = vpow2.f32 %v278_v18 }
 0x49a   :  { %v275_v19 = vpop.xlane.xlu2 %274 }
 0x49b   :  { %v277_v20 = vsub.f32 %v269_v14, %v275_v19 }
 0x49d   :  { %v769_v21 = vpop.eup %768  ;;  %v280_v24 = vmul.f32 1.442695, %v277_v20  ;;  %v753_v20 = vld [vmem:[%s1024_s4 + $0x2] ss:$0 sm:$0xff] }
 0x49e   :  { %v282_v25 = vsel %vm132_vm4, %v769_v21, 0.0 }
 0x49f   :  { %770 = vpow2.f32 %v280_v24  ;;  %283 = vadd.xlane.f32.xlu0 %v282_v25 }
 0x4a5   :  { %v771_v26 = vpop.eup %770 }
 0x4a6   :  { %v285_v27 = vsel %vm132_vm4, %v771_v26, 0.0 }
 0x4a7   :  { %286 = vadd.xlane.f32.xlu0 %v285_v27 }
 0x512   :  { %v284_v30 = vpop.xlane.xlu0 %283 }
 0x513   :  { %772 = vrcp.f32 %v284_v30 }
 0x519   :  { %v773_v31 = vpop.eup %772 }
 0x51a   :  { %v287_v32 = vpop.xlane.xlu0 %286  ;;  %v290_v33 = vmul.f32 %v773_v31, %v769_v21 }
 0x51b   :  { %774 = vrcp.f32 %v287_v32 }
 0x51c   :  { %716 = vmatmul.msk.f32.vlgmr.msrb.gmra.mxu1 %vm132_vm4, %v290_v33  ;;  %776 = vrcp.f32 %v830_v51  ;;  %v571_v51 = vld [vmem:[#allocation2 + $0x80] sm:$0xff] }
 0x521   :  { %v775_v34 = vpop.eup %774 }
 0x522   :  { %v291_v35 = vmul.f32 %v775_v34, %v771_v26  ;;  %v777_v52 = vpop.eup %776  ;;  %v754_v26 = vld [vmem:[%s1024_s4 + $0x3] ss:$0 sm:$0xff] }
 0x523   :  { %v402_v53 = vmul.f32 32.0, %v777_v52  ;;  %vm406_vm5 = vweird.f32 %v777_v52 }
 0x524   :  { %717 = vmatmul.msk.f32.gmra.mxu1 %vm132_vm4, %v291_v35 }
 0x525   :  { %v403_v54 = vsub.f32 1.0, %v402_v53 }
 0x527   :  { %v404_v55 = vmul.f32 %v777_v52, %v403_v54 }
 0x529   :  { %v405_v56 = vadd.f32 %v777_v52, %v404_v55  ;;  %v570_v55 = vld [vmem:[#allocation2 + $0x78] sm:$0xff] }
 0x599   :  { %v321_v36 = vpop.f32.mrf.mxu1 }
 0x59a   :  { %718 = vmatmul.msk.f32.vlgmr.msrb.gmra.mxu2 %vm132_vm4, %v321_v36  ;;  %v755_v36 = vld [vmem:[%s1024_s4 + $0x4] ss:$0 sm:$0xff] }
 0x5a1   :  { %v324_v37 = vpop.f32.mrf.mxu1 }
 0x5a2   :  { %719 = vmatmul.msk.f32.gmra.mxu2 %vm132_vm4, %v324_v37 }
 0x61d   :  { %v352_v40 = vpop.f32.mrf.mxu2 }
 0x61e   :  { %v382_v41 = vadd.f32 %v381_v38, %v352_v40 }
 0x620   :  { %v389_v42 = vadd.f32 %v752_v39, %v382_v41 }
 0x622   :  { %v391_v43 = vadd.f32 %v389_v42, %v897_v22  ;;  %v947_v22 = vsel %vm406_vm5, %v777_v52, %v405_v56 }
 0x624   :  { %v395_v44 = vsel %vm96_vm3, %v391_v43, 0.0 }
 0x625   :  { %396 = vadd.xlane.f32.xlu2 %v395_v44  ;;  %v355_v46 = vpop.f32.mrf.mxu2 }
 0x626   :  { %v385_v47 = vadd.f32 %v384_v45, %v355_v46  ;;  %v574_v45 = vld [vmem:[#allocation2 + $0x98] sm:$0xff] }
 0x627   :  { %591 = vmatpush.msra.mxu1 %v574_v45 }
 0x628   :  { %v390_v48 = vadd.f32 %v752_v39, %v385_v47  ;;  %v573_v47 = vld [vmem:[#allocation2 + $0x90] sm:$0xff] }
 0x629   :  { %592 = vmatpush.msra.mxu1 %v573_v47 }
 0x62a   :  { %v392_v49 = vadd.f32 %v390_v48, %v901_v23 }
 0x62c   :  { %v398_v50 = vsel %vm96_vm3, %v392_v49, 0.0 }
 0x62d   :  { %399 = vadd.xlane.f32.xlu1 %v398_v50 }
 0x698   :  { %v397_v57 = vpop.xlane.xlu2 %396 }
 0x699   :  { %v408_v58 = vmul.f32 %v947_v22, %v397_v57  ;;  %v569_v57 = vld [vmem:[#allocation2 + $0x70] sm:$0xff] }
 0x69b   :  { %v410_v59 = vsub.f32 %v391_v43, %v408_v58 }
 0x69d   :  { %v412_v60 = vmul.f32 %v410_v59, %v410_v59 }
 0x69f   :  { %v414_v23 = vsel %vm96_vm3, %v412_v60, 0.0 }
 0x6a0   :  { %v400_v61 = vpop.xlane.xlu1 %399  ;;  %415 = vadd.xlane.f32.xlu2 %v414_v23  ;;  %v568_v23 = vld [vmem:[#allocation2 + $0x68] sm:$0xff] }
 0x6a1   :  { %v409_v62 = vmul.f32 %v947_v22, %v400_v61  ;;  %v567_v61 = vld [vmem:[#allocation2 + $0x60] sm:$0xff] }
 0x6a3   :  { %v411_v63 = vsub.f32 %v392_v49, %v409_v62  ;;  %v572_v49 = vld [vmem:[#allocation2 + $0x88] sm:$0xff] }
 0x6a4   :  { %593 = vmatpush.msra.mxu1 %v572_v49 }
 0x6a5   :  { %v413_v0 = vmul.f32 %v411_v63, %v411_v63 }
 0x6a6   :  { %594 = vmatpush.msra.mxu1 %v571_v51 }
 0x6a7   :  { %v417_v1 = vsel %vm96_vm3, %v413_v0, 0.0 }
 0x6a8   :  { %418 = vadd.xlane.f32.xlu1 %v417_v1  ;;  %595 = vmatpush.msra.mxu1 %v570_v55 }
 0x6aa   :  { %596 = vmatpush.msra.mxu1 %v569_v57 }
 0x6ac   :  { %597 = vmatpush.msra.mxu1 %v568_v23 }
 0x6ae   :  { %598 = vmatpush.msra.mxu1 %v567_v61 }
 0x713   :  { %v416_v6 = vpop.xlane.xlu2 %415 }
 0x714   :  { %v420_v7 = vmul.f32 %v416_v6, %v947_v22 }
 0x716   :  { %v422_v8 = vadd.f32 1e-12, %v420_v7 }
 0x718   :  { %778 = vrsqrt.f32 %v422_v8  ;;  %vm430_vm7 = vweird.f32 %v422_v8 }
 0x71b   :  { %v419_v9 = vpop.xlane.xlu1 %418 }
 0x71c   :  { %v421_v10 = vmul.f32 %v419_v9, %v947_v22 }
 0x71e   :  { %v779_v11 = vpop.eup %778  ;;  %v423_v12 = vadd.f32 1e-12, %v421_v10 }
 0x71f   :  { %v425_v13 = vmul.f32 %v779_v11, %v422_v8  ;;  %vm431_vm6 = vweird.f32 %v779_v11 }
 0x720   :  { %780 = vrsqrt.f32 %v423_v12  ;;  %vm432_vm8 = vmor %vm430_vm7, %vm431_vm6  ;;  %vm440_vm10 = vweird.f32 %v423_v12 }
 0x721   :  { %v426_v14 = vmul.f32 %v779_v11, %v425_v13 }
 0x723   :  { %v427_v15 = vmul.f32 0.5, %v426_v14 }
 0x725   :  { %v428_v16 = vsub.f32 1.5, %v427_v15 }
 0x726   :  { %v781_v17 = vpop.eup %780 }
 0x727   :  { %v429_v18 = vmul.f32 %v779_v11, %v428_v16  ;;  %v435_v19 = vmul.f32 %v781_v17, %v423_v12  ;;  %vm441_vm9 = vweird.f32 %v781_v17 }
 0x728   :  { %vm442_vm11 = vmor %vm440_vm10, %vm441_vm9 }
 0x729   :  { %v433_v21 = vsel %vm432_vm8, %v779_v11, %v429_v18  ;;  %v436_v24 = vmul.f32 %v781_v17, %v435_v19 }
 0x72a   :  { %v444_v25 = vmul.f32 %v433_v21, %v410_v59 }
 0x72b   :  { %v437_v27 = vmul.f32 0.5, %v436_v24 }
 0x72c   :  { %v447_v28 = vmul.f32 %v753_v20, %v444_v25 }
 0x72d   :  { %v438_v29 = vsub.f32 1.5, %v437_v27 }
 0x72e   :  { %v961_v30 = vadd.f32 %v754_v26, %v447_v28 }
 0x72f   :  { %v439_v31 = vmul.f32 %v781_v17, %v438_v29 }
 0x730   :  { %722 = vmatmul.msk.f32.vlgmr.msra.gmra.mxu3 %vm96_vm3, %v961_v30 }
 0x731   :  { %v443_v32 = vsel %vm442_vm11, %v781_v17, %v439_v31 }
 0x732   :  { %v445_v33 = vmul.f32 %v443_v32, %v411_v63 }
 0x734   :  { %v448_v34 = vmul.f32 %v753_v20, %v445_v33 }
 0x736   :  { %v965_v35 = vadd.f32 %v754_v26, %v448_v34 }
 0x738   :  { %723 = vmatmul.msk.f32.gmra.mxu3 %vm96_vm3, %v965_v35 }
 0x7b3   :  { %v481_v37 = vpop.f32.mrf.mxu3 }
 0x7b4   :  { %v972_v38 = vadd.f32 %v755_v36, %v481_v37 }
 0x7b6   :  { %v975_v39 = vmul.f32 0.70710677, %v972_v38 }
 0x7b8   :  { %v495_v40 = vand.u32 2147483647, %v975_v39  ;;  %vm491_vm6 = vcmp.ge.f32.partialorder %v975_v39, 0.0 }
 0x7ba   :  { %v497_v41 = vmul.f32 0.3275911, %v495_v40  ;;  %v549_v3 = vsub.f32 0.0, %v495_v40 }
 0x7bb   :  { %v484_v42 = vpop.f32.mrf.mxu3 }
 0x7bc   :  { %v499_v43 = vadd.f32 1.0, %v497_v41  ;;  %v978_v44 = vadd.f32 %v755_v36, %v484_v42  ;;  %v551_v9 = vmul.f32 %v549_v3, %v495_v40  ;;  %v831_v42 = vmov -1.0  }
 0x7be   :  { %782 = vrcp.f32 %v499_v43  ;;  %v981_v46 = vmul.f32 0.70710677, %v978_v44  ;;  %v512_v58 = vand.u32 2147483648, %v499_v43  ;;  %v510_v60 = vand.u32 2147483647, %v499_v43 }
 0x7bf   :  { %vm506_vm13 = vweird.f32 %v499_v43  ;;  %v553_v16 = vmul.f32 1.442695, %v551_v9  ;;  %v488_v57 = vmul.f32 0.5, %v978_v44 }
 0x7c0   :  { %v496_v48 = vand.u32 2147483647, %v981_v46  ;;  %v513_v63 = vor.u32 1.1754944e-38, %v512_v58  ;;  %vm511_vm15 = vcmp.eq.f32.partialorder %v510_v60, 8.507059e+37  ;;  %vm492_vm7 = vcmp.ge.f32.partialorder %v981_v46, 0.0 }
 0x7c1   :  { %v494_v55 = vsel %vm492_vm7, 1.0, %v831_v42 }
 0x7c2   :  { %v498_v50 = vmul.f32 0.3275911, %v496_v48  ;;  %v550_v19 = vsub.f32 0.0, %v496_v48 }
 0x7c4   :  { %v783_v52 = vpop.eup %782  ;;  %v500_v54 = vadd.f32 1.0, %v498_v50  ;;  %v552_v27 = vmul.f32 %v550_v19, %v496_v48  ;;  %v487_v48 = vmul.f32 0.5, %v972_v38  ;;  %v756_v38 = vld [vmem:[%s1024_s4 + $0x5] ss:$0 sm:$0xff] }
 0x7c5   :  { %v502_v53 = vmul.f32 %v783_v52, %v499_v43  ;;  %vm507_vm12 = vweird.f32 %v783_v52  ;;  %v493_v43 = vsel %vm491_vm6, 1.0, %v831_v42 }
 0x7c6   :  { %784 = vrcp.f32 %v500_v54  ;;  %vm508_vm14 = vmor %vm506_vm13, %vm507_vm12  ;;  %v527_v8 = vand.u32 2147483648, %v500_v54  ;;  %v525_v11 = vand.u32 2147483647, %v500_v54  ;;  %vm521_vm2 = vweird.f32 %v500_v54 }
 0x7c7   :  { %v503_v56 = vsub.f32 1.0, %v502_v53  ;;  %786 = vpow2.f32 %v553_v16  ;;  %v555_v33 = vmul.f32 1.442695, %v552_v27 }
 0x7c8   :  { %v528_v15 = vor.u32 1.1754944e-38, %v527_v8  ;;  %vm526_vm5 = vcmp.eq.f32.partialorder %v525_v11, 8.507059e+37  ;;  %v661_v11 = vld [vmem:[#allocation2 + $0xa8] sm:$0xff] }
 0x7c9   :  { %v504_v59 = vmul.f32 %v783_v52, %v503_v56  ;;  %788 = vpow2.f32 %v555_v33  ;;  %v758_v33 = vld [vmem:[%s1024_s4 + $0x7] ss:$0 sm:$0xff] }
 0x7cb   :  { %v505_v62 = vadd.f32 %v783_v52, %v504_v59 }
 0x7cc   :  { %v785_v0 = vpop.eup %784 }
 0x7cd   :  { %v509_v1 = vsel %vm508_vm14, %v783_v52, %v505_v62  ;;  %v517_v4 = vmul.f32 %v785_v0, %v500_v54  ;;  %vm522_vm1 = vweird.f32 %v785_v0  ;;  %v787_v34 = vpop.eup %786 }
 0x7ce   :  { %v514_v2 = vsel %vm511_vm15, %v513_v63, %v509_v1  ;;  %vm523_vm4 = vmor %vm521_vm2, %vm522_vm1 }
 0x7cf   :  { %v531_v5 = vmul.f32 1.0614054, %v514_v2  ;;  %v518_v6 = vsub.f32 1.0, %v517_v4  ;;  %v789_v52 = vpop.eup %788 }
 0x7d1   :  { %v533_v7 = vadd.f32 -1.4531521, %v531_v5  ;;  %v519_v10 = vmul.f32 %v785_v0, %v518_v6 }
 0x7d3   :  { %v535_v12 = vmul.f32 %v533_v7, %v514_v2  ;;  %v520_v13 = vadd.f32 %v785_v0, %v519_v10  ;;  %v662_v10 = vld [vmem:[#allocation2 + $0xb0] sm:$0xff] }
 0x7d5   :  { %v537_v14 = vadd.f32 1.4214138, %v535_v12  ;;  %v524_v17 = vsel %vm523_vm4, %v785_v0, %v520_v13  ;;  %v660_v12 = vld [vmem:[#allocation2 + $0xa0] sm:$0xff] }
 0x7d6   :  { %v529_v20 = vsel %vm526_vm5, %v528_v15, %v524_v17 }
 0x7d7   :  { %v539_v18 = vmul.f32 %v537_v14, %v514_v2  ;;  %v532_v21 = vmul.f32 1.0614054, %v529_v20 }
 0x7d9   :  { %v541_v24 = vadd.f32 -0.28449672, %v539_v18  ;;  %v534_v25 = vadd.f32 -1.4531521, %v532_v21 }
 0x7db   :  { %v543_v26 = vmul.f32 %v541_v24, %v514_v2  ;;  %v536_v28 = vmul.f32 %v534_v25, %v529_v20 }
 0x7dd   :  { %v545_v29 = vadd.f32 0.2548296, %v543_v26  ;;  %v538_v31 = vadd.f32 1.4214138, %v536_v28  ;;  %v757_v28 = vld [vmem:[%s1024_s4 + $0x6] ss:$0 sm:$0xff] }
 0x7df   :  { %v547_v32 = vmul.f32 %v545_v29, %v514_v2  ;;  %v540_v36 = vmul.f32 %v538_v31, %v529_v20 }
 0x7e1   :  { %v557_v37 = vmul.f32 %v787_v34, %v547_v32  ;;  %v542_v40 = vadd.f32 -0.28449672, %v540_v36 }
 0x7e3   :  { %v559_v41 = vsub.f32 1.0, %v557_v37  ;;  %v544_v45 = vmul.f32 %v542_v40, %v529_v20 }
 0x7e5   :  { %v561_v47 = vmul.f32 %v559_v41, %v493_v43  ;;  %v546_v49 = vadd.f32 0.2548296, %v544_v45 }
 0x7e7   :  { %v563_v50 = vadd.f32 1.0, %v561_v47  ;;  %v548_v51 = vmul.f32 %v546_v49, %v529_v20  ;;  %v759_v49 = vld [vmem:[%s1024_s4 + $0x8] ss:$0 sm:$0xff] }
 0x7e9   :  { %v565_v53 = vmul.f32 %v563_v50, %v487_v48  ;;  %v558_v54 = vmul.f32 %v789_v52, %v548_v51 }
 0x7eb   :  { %724 = vmatmul.msk.f32.vlgmr.msra.gmra.mxu1 %vm58_vm0, %v565_v53  ;;  %v560_v39 = vsub.f32 1.0, %v558_v54 }
 0x7ed   :  { %v562_v56 = vmul.f32 %v560_v39, %v494_v55 }
 0x7ef   :  { %v564_v58 = vadd.f32 1.0, %v562_v56 }
 0x7f1   :  { %v566_v59 = vmul.f32 %v564_v58, %v488_v57 }
 0x7f3   :  { %725 = vmatmul.msk.f32.gmra.mxu1 %vm58_vm0, %v566_v59 }
 0x868   :  { %v600_v60 = vpop.f32.mrf.mxu1 }
 0x869   :  { %v601_v23 = vadd.f32 %v756_v38, %v600_v60 }
 0x86b   :  { %v606_v46 = vadd.f32 %v601_v23, %v961_v30 }
 0x86d   :  { %v610_v61 = vsel %vm96_vm3, %v606_v46, 0.0 }
 0x86e   :  { %611 = vadd.xlane.f32.xlu2 %v610_v61 }
 0x870   :  { %v603_v62 = vpop.f32.mrf.mxu1 }
 0x871   :  { %v604_v63 = vadd.f32 %v756_v38, %v603_v62 }
 0x873   :  { %v607_v0 = vadd.f32 %v604_v63, %v965_v35  ;;  %v663_v35 = vld [vmem:[#allocation2 + $0xb8] sm:$0xff] }
 0x874   :  { %684 = vmatpush.msra.mxu2 %v663_v35 }
 0x875   :  { %v613_v44 = vsel %vm96_vm3, %v607_v0, 0.0 }
 0x876   :  { %614 = vadd.xlane.f32.xlu1 %v613_v44  ;;  %685 = vmatpush.msra.mxu2 %v662_v10 }
 0x878   :  { %686 = vmatpush.msra.mxu2 %v661_v11 }
 0x87a   :  { %687 = vmatpush.msra.mxu2 %v660_v12 }
 0x8e1   :  { %v612_v1 = vpop.xlane.xlu2 %611 }
 0x8e2   :  { %v616_v2 = vmul.f32 %v612_v1, %v947_v22 }
 0x8e4   :  { %v618_v3 = vsub.f32 %v606_v46, %v616_v2 }
 0x8e6   :  { %v620_v4 = vmul.f32 %v618_v3, %v618_v3 }
 0x8e8   :  { %v622_v5 = vsel %vm96_vm3, %v620_v4, 0.0 }
 0x8e9   :  { %623 = vadd.xlane.f32.xlu2 %v622_v5  ;;  %v615_v6 = vpop.xlane.xlu1 %614 }
 0x8ea   :  { %v617_v30 = vmul.f32 %v615_v6, %v947_v22 }
 0x8ec   :  { %v619_v7 = vsub.f32 %v607_v0, %v617_v30 }
 0x8ee   :  { %v621_v8 = vmul.f32 %v619_v7, %v619_v7 }
 0x8f0   :  { %v625_v9 = vsel %vm96_vm3, %v621_v8, 0.0 }
 0x8f1   :  { %626 = vadd.xlane.f32.xlu1 %v625_v9 }
 0x95c   :  { %v624_v13 = vpop.xlane.xlu2 %623 }
 0x95d   :  { %v628_v14 = vmul.f32 %v624_v13, %v947_v22 }
 0x95f   :  { %v630_v15 = vadd.f32 1e-12, %v628_v14 }
 0x961   :  { %790 = vrsqrt.f32 %v630_v15  ;;  %vm638_vm8 = vweird.f32 %v630_v15 }
 0x964   :  { %v627_v16 = vpop.xlane.xlu1 %626 }
 0x965   :  { %v629_v17 = vmul.f32 %v627_v16, %v947_v22 }
 0x967   :  { %v791_v18 = vpop.eup %790  ;;  %v631_v20 = vadd.f32 1e-12, %v629_v17 }
 0x968   :  { %v633_v19 = vmul.f32 %v791_v18, %v630_v15  ;;  %vm639_vm0 = vweird.f32 %v791_v18 }
 0x969   :  { %792 = vrsqrt.f32 %v631_v20  ;;  %vm640_vm9 = vmor %vm638_vm8, %vm639_vm0  ;;  %vm648_vm11 = vweird.f32 %v631_v20 }
 0x96a   :  { %v634_v21 = vmul.f32 %v791_v18, %v633_v19 }
 0x96c   :  { %v635_v24 = vmul.f32 0.5, %v634_v21 }
 0x96e   :  { %v636_v25 = vsub.f32 1.5, %v635_v24 }
 0x96f   :  { %v793_v26 = vpop.eup %792 }
 0x970   :  { %v637_v27 = vmul.f32 %v791_v18, %v636_v25  ;;  %v643_v29 = vmul.f32 %v793_v26, %v631_v20  ;;  %vm649_vm10 = vweird.f32 %v793_v26 }
 0x971   :  { %vm650_vm12 = vmor %vm648_vm11, %vm649_vm10 }
 0x972   :  { %v641_v31 = vsel %vm640_vm9, %v791_v18, %v637_v27  ;;  %v644_v22 = vmul.f32 %v793_v26, %v643_v29 }
 0x973   :  { %v652_v32 = vmul.f32 %v641_v31, %v618_v3 }
 0x974   :  { %v645_v36 = vmul.f32 0.5, %v644_v22 }
 0x975   :  { %v655_v34 = vmul.f32 %v757_v28, %v652_v32 }
 0x976   :  { %v646_v37 = vsub.f32 1.5, %v645_v36 }
 0x977   :  { %v658_v40 = vadd.f32 %v758_v33, %v655_v34 }
 0x978   :  { %v647_v41 = vmul.f32 %v793_v26, %v646_v37 }
 0x979   :  { %726 = vmatmul.msk.f32.vlgmr.msra.gmra.mxu2 %vm96_vm3, %v658_v40 }
 0x97a   :  { %v651_v42 = vsel %vm650_vm12, %v793_v26, %v647_v41 }
 0x97b   :  { %v653_v43 = vmul.f32 %v651_v42, %v619_v7 }
 0x97d   :  { %v656_v45 = vmul.f32 %v757_v28, %v653_v43 }
 0x97f   :  { %v659_v47 = vadd.f32 %v758_v33, %v656_v45 }
 0x981   :  { %727 = vmatmul.msk.f32.gmra.mxu2 %vm96_vm3, %v659_v47 }
 0x9fc   :  { %v689_v48 = vpop.f32.mrf.mxu2 }
 0x9fd   :  { %v690_v50 = vadd.f32 %v759_v49, %v689_v48 }
 0x9ff   :  { %695 = vst [vmem:[%s1025_s5] sm:$0xff] %v690_v50 }
 0xa04   :  { %v692_v51 = vpop.f32.mrf.mxu2 }
 0xa05   :  { %v693_v52 = vadd.f32 %v759_v49, %v692_v51 }
 0xa07   :  { %696 = vst [vmem:[%s1025_s5 + $0x8] sm:$0xff] %v693_v52 }
 0xa08   :  { %701 = vsyncpa [#allocation3], 1 }

</bundles_post_ra>
